<compile_context>
chip_gen: v5e
topology: v5e:2x2
jax: 0.10.0
libtpu: 0.0.40
codegen_flags: <defaults>
</compile_context>

<pallas_src>
import functools
import math

import jax
import jax.numpy as jnp
from jax.experimental import pallas as pl
from jax.experimental.pallas import tpu as pltpu

# Synthetic network.yaml params (deterministic, in-script).
NET_PARAMS = {
    "Simulation": {
        "steps": 8,
        "dt": 1.0,
        "a1": 0.5,
        "Vth": 0.3,
        "tau": 0.25,
    }
}
ARGS = {
    "steps": NET_PARAMS["Simulation"]["steps"],
    "dt": NET_PARAMS["Simulation"]["dt"],   # unused in the forward pass
    "an": NET_PARAMS["Simulation"]["a1"],   # surrogate-grad width (backward only)
    "Vth": NET_PARAMS["Simulation"]["Vth"],
    "tau": NET_PARAMS["Simulation"]["tau"],
}

_LANES = 128
_SUBLANES = 8
_TARGET_BLOCK_BYTES = 4 << 20   # ~4 MiB input block per grid step


def _lif_voltage_kernel(x_ref, u_ref, *, tau, vth):
    """x_ref: (T, tr, 128) time-major input block; u_ref: (tr, 128) final voltage."""
    T = x_ref.shape[0]
    # t = 0: u_prev = 0 and o_prev = 0  ->  u = x[..., 0].
    u = x_ref[0].astype(jnp.float32)
    # T is small & static -> unrolled; the only carry across steps is `u`.
    for t in range(1, T):
        x_t = x_ref[t].astype(jnp.float32)
        # Spiked last step -> full reset (tau*u*0 + x_t); otherwise leak.
        u = jnp.where(u > vth, x_t, tau * u + x_t)
    u_ref[...] = u.astype(u_ref.dtype)


def _pick_row_tile(R, T, itemsize):
    """Row-tile (multiple of 8, or the full extent) sized from the VMEM budget,
    keeping >= 2 grid steps whenever possible for v7x megacore sharding."""
    if R <= _SUBLANES:
        return R
    # Rows per block from the byte budget: block = T * tr * 128 * itemsize.
    tr = _TARGET_BLOCK_BYTES // (T * _LANES * itemsize)
    tr = max(_SUBLANES, (tr // _SUBLANES) * _SUBLANES)
    if R >= 2 * _SUBLANES:
        # Cap so cdiv(R, tr) >= 2: dimension_semantics=("parallel",) can only
        # shard a grid axis with >= 2 steps across v7x's two TensorCores.
        tr = min(tr, max(_SUBLANES, (R // 2) // _SUBLANES * _SUBLANES))
    return min(tr, R)


def _lif_core(xt):
    """xt: (T, R, 128) time-major, lane-dense.  Returns (R, 128) float32."""
    T, R, L = xt.shape
    tr = _pick_row_tile(R, T, jnp.dtype(xt.dtype).itemsize)
    kernel = functools.partial(
        _lif_voltage_kernel, tau=float(ARGS["tau"]), vth=float(ARGS["Vth"]))
    return pl.pallas_call(
        kernel,
        out_shape=jax.ShapeDtypeStruct((R, L), jnp.float32),
        grid_spec=pltpu.PrefetchScalarGridSpec(
            num_scalar_prefetch=0,
            grid=(pl.cdiv(R, tr),),           # partial last block allowed
            # NOTE: pipeline_mode=pl.Buffered(3) on the input spec is a cheap
            # knob to sweep if DMA-issue gaps show up; default double
            # buffering already hides the short VPU pass behind the block DMA.
            in_specs=[pl.BlockSpec((T, tr, L), lambda i: (0, i, 0))],
            out_specs=pl.BlockSpec((tr, L), lambda i: (i, 0)),
        ),
        compiler_params=pltpu.CompilerParams(
            dimension_semantics=("parallel",)),
    )(xt)


@jax.jit
def lif_voltage_forward_time_major(xt):
    """Preferred entry: xt is time-major, shape (T, *lead).  Zero relayout
    (pure reshape) when prod(lead) % 128 == 0.  Returns float32 (*lead,)."""
    T = xt.shape[0]
    lead = xt.shape[1:]
    M = math.prod(lead)
    x2 = xt.reshape(T, M)                      # pure reshape, no copy
    Mp = pl.cdiv(M, _LANES) * _LANES
    if Mp != M:                                 # rare ragged tail: one pad pass
        x2 = jnp.pad(x2, ((0, 0), (0, Mp - M)))
    u = _lif_core(x2.reshape(T, Mp // _LANES, _LANES))
    return u.reshape(Mp)[:M].reshape(lead)


@jax.jit
def lif_voltage_forward(x):
    """PyTorch-contract entry: x has trailing time axis (..., T); returns the
    final membrane voltage, float32, shape x.shape[:-1]."""
    # TODO(synk): this transpose is one extra HBM read+write pass over x; feed
    # activations time-major via lif_voltage_forward_time_major to avoid it
    # (an in-kernel lane-deinterleave of the (tr, 128*T) layout would need
    # lane-strided shuffles that are not reliably lowerable today).
    return lif_voltage_forward_time_major(jnp.moveaxis(x, -1, 0))


def _lif_voltage_ref(x):
    """Pure-JAX reference mirroring the PyTorch loop."""
    T = x.shape[-1]
    u = jnp.zeros(x.shape[:-1], dtype=jnp.float32)
    o = jnp.zeros(x.shape[:-1], dtype=jnp.float32)
    for t in range(T):
        u = ARGS["tau"] * u * (1.0 - o) + x[..., t].astype(jnp.float32)
        o = (u > ARGS["Vth"]).astype(jnp.float32)
    return u


# TODO(synk): SpikeAct's surrogate gradient (backward) is not implemented; only
# the forward voltage dynamics are needed here.

if __name__ == "__main__":
    key = jax.random.PRNGKey(0)
    T = NET_PARAMS["Simulation"]["steps"]
    # (N, C, H, W, T) conv-style tensor with trailing time axis, T = steps.
    x = jax.random.normal(key, (2, 4, 16, 16, T), dtype=jnp.float32)

    u = jax.block_until_ready(lif_voltage_forward(x))
    u_ref = _lif_voltage_ref(x)
    assert u.shape == x.shape[:-1], u.shape
    assert u.dtype == jnp.float32
    assert bool(jnp.allclose(u, u_ref, rtol=1e-5, atol=1e-5)), (
        float(jnp.max(jnp.abs(u - u_ref))))

    # Recommended zero-relayout path: producer hands activations time-major.
    u_tm = jax.block_until_ready(
        lif_voltage_forward_time_major(jnp.moveaxis(x, -1, 0)))
    assert bool(jnp.allclose(u_tm, u_ref, rtol=1e-5, atol=1e-5)), (
        float(jnp.max(jnp.abs(u_tm - u_ref))))

    print("KERNEL_OK")
</pallas_src>

<mosaic_0001>
module attributes {stable_mosaic.version = 11 : i64} {
  func.func @_lif_voltage_kernel(%arg0: i32, %arg1: memref<8x8x128xf32, #tpu.memory_space<vmem>>, %arg2: memref<8x128xf32, #tpu.memory_space<vmem>>) attributes {dimension_semantics = [#tpu.dimension_semantics<parallel>], iteration_bounds = array<i64: 2>, scalar_prefetch = 0 : i64, scratch_operands = 0 : i64, tpu.core_type = #tpu.core_type<tc>, window_params = [{transform_indices = @transform_0, window_bounds = array<i64: 8, 8, 128>}, {transform_indices = @transform_1, window_bounds = array<i64: 8, 128>}]} {
    %c0 = arith.constant 0 : index
    %c0_0 = arith.constant 0 : index
    %c0_1 = arith.constant 0 : index
    %0 = vector.load %arg1[%c0, %c0_0, %c0_1] : memref<8x8x128xf32, #tpu.memory_space<vmem>>, vector<1x8x128xf32>
    %1 = vector.shape_cast %0 : vector<1x8x128xf32> to vector<8x128xf32>
    %c1 = arith.constant 1 : index
    %c0_2 = arith.constant 0 : index
    %c0_3 = arith.constant 0 : index
    %2 = vector.load %arg1[%c1, %c0_2, %c0_3] : memref<8x8x128xf32, #tpu.memory_space<vmem>>, vector<1x8x128xf32>
    %3 = vector.shape_cast %2 : vector<1x8x128xf32> to vector<8x128xf32>
    %cst = arith.constant 3.000000e-01 : f32
    %4 = vector.broadcast %cst : f32 to vector<8x128xf32>
    %5 = arith.cmpf ogt, %1, %4 : vector<8x128xf32>
    %cst_4 = arith.constant 2.500000e-01 : f32
    %6 = vector.broadcast %cst_4 : f32 to vector<8x128xf32>
    %7 = arith.mulf %6, %1 : vector<8x128xf32>
    %8 = arith.addf %7, %3 : vector<8x128xf32>
    %9 = arith.select %5, %3, %8 : vector<8x128xi1>, vector<8x128xf32>
    %c2 = arith.constant 2 : index
    %c0_5 = arith.constant 0 : index
    %c0_6 = arith.constant 0 : index
    %10 = vector.load %arg1[%c2, %c0_5, %c0_6] : memref<8x8x128xf32, #tpu.memory_space<vmem>>, vector<1x8x128xf32>
    %11 = vector.shape_cast %10 : vector<1x8x128xf32> to vector<8x128xf32>
    %cst_7 = arith.constant 3.000000e-01 : f32
    %12 = vector.broadcast %cst_7 : f32 to vector<8x128xf32>
    %13 = arith.cmpf ogt, %9, %12 : vector<8x128xf32>
    %cst_8 = arith.constant 2.500000e-01 : f32
    %14 = vector.broadcast %cst_8 : f32 to vector<8x128xf32>
    %15 = arith.mulf %14, %9 : vector<8x128xf32>
    %16 = arith.addf %15, %11 : vector<8x128xf32>
    %17 = arith.select %13, %11, %16 : vector<8x128xi1>, vector<8x128xf32>
    %c3 = arith.constant 3 : index
    %c0_9 = arith.constant 0 : index
    %c0_10 = arith.constant 0 : index
    %18 = vector.load %arg1[%c3, %c0_9, %c0_10] : memref<8x8x128xf32, #tpu.memory_space<vmem>>, vector<1x8x128xf32>
    %19 = vector.shape_cast %18 : vector<1x8x128xf32> to vector<8x128xf32>
    %cst_11 = arith.constant 3.000000e-01 : f32
    %20 = vector.broadcast %cst_11 : f32 to vector<8x128xf32>
    %21 = arith.cmpf ogt, %17, %20 : vector<8x128xf32>
    %cst_12 = arith.constant 2.500000e-01 : f32
    %22 = vector.broadcast %cst_12 : f32 to vector<8x128xf32>
    %23 = arith.mulf %22, %17 : vector<8x128xf32>
    %24 = arith.addf %23, %19 : vector<8x128xf32>
    %25 = arith.select %21, %19, %24 : vector<8x128xi1>, vector<8x128xf32>
    %c4 = arith.constant 4 : index
    %c0_13 = arith.constant 0 : index
    %c0_14 = arith.constant 0 : index
    %26 = vector.load %arg1[%c4, %c0_13, %c0_14] : memref<8x8x128xf32, #tpu.memory_space<vmem>>, vector<1x8x128xf32>
    %27 = vector.shape_cast %26 : vector<1x8x128xf32> to vector<8x128xf32>
    %cst_15 = arith.constant 3.000000e-01 : f32
    %28 = vector.broadcast %cst_15 : f32 to vector<8x128xf32>
    %29 = arith.cmpf ogt, %25, %28 : vector<8x128xf32>
    %cst_16 = arith.constant 2.500000e-01 : f32
    %30 = vector.broadcast %cst_16 : f32 to vector<8x128xf32>
    %31 = arith.mulf %30, %25 : vector<8x128xf32>
    %32 = arith.addf %31, %27 : vector<8x128xf32>
    %33 = arith.select %29, %27, %32 : vector<8x128xi1>, vector<8x128xf32>
    %c5 = arith.constant 5 : index
    %c0_17 = arith.constant 0 : index
    %c0_18 = arith.constant 0 : index
    %34 = vector.load %arg1[%c5, %c0_17, %c0_18] : memref<8x8x128xf32, #tpu.memory_space<vmem>>, vector<1x8x128xf32>
    %35 = vector.shape_cast %34 : vector<1x8x128xf32> to vector<8x128xf32>
    %cst_19 = arith.constant 3.000000e-01 : f32
    %36 = vector.broadcast %cst_19 : f32 to vector<8x128xf32>
    %37 = arith.cmpf ogt, %33, %36 : vector<8x128xf32>
    %cst_20 = arith.constant 2.500000e-01 : f32
    %38 = vector.broadcast %cst_20 : f32 to vector<8x128xf32>
    %39 = arith.mulf %38, %33 : vector<8x128xf32>
    %40 = arith.addf %39, %35 : vector<8x128xf32>
    %41 = arith.select %37, %35, %40 : vector<8x128xi1>, vector<8x128xf32>
    %c6 = arith.constant 6 : index
    %c0_21 = arith.constant 0 : index
    %c0_22 = arith.constant 0 : index
    %42 = vector.load %arg1[%c6, %c0_21, %c0_22] : memref<8x8x128xf32, #tpu.memory_space<vmem>>, vector<1x8x128xf32>
    %43 = vector.shape_cast %42 : vector<1x8x128xf32> to vector<8x128xf32>
    %cst_23 = arith.constant 3.000000e-01 : f32
    %44 = vector.broadcast %cst_23 : f32 to vector<8x128xf32>
    %45 = arith.cmpf ogt, %41, %44 : vector<8x128xf32>
    %cst_24 = arith.constant 2.500000e-01 : f32
    %46 = vector.broadcast %cst_24 : f32 to vector<8x128xf32>
    %47 = arith.mulf %46, %41 : vector<8x128xf32>
    %48 = arith.addf %47, %43 : vector<8x128xf32>
    %49 = arith.select %45, %43, %48 : vector<8x128xi1>, vector<8x128xf32>
    %c7 = arith.constant 7 : index
    %c0_25 = arith.constant 0 : index
    %c0_26 = arith.constant 0 : index
    %50 = vector.load %arg1[%c7, %c0_25, %c0_26] : memref<8x8x128xf32, #tpu.memory_space<vmem>>, vector<1x8x128xf32>
    %51 = vector.shape_cast %50 : vector<1x8x128xf32> to vector<8x128xf32>
    %cst_27 = arith.constant 3.000000e-01 : f32
    %52 = vector.broadcast %cst_27 : f32 to vector<8x128xf32>
    %53 = arith.cmpf ogt, %49, %52 : vector<8x128xf32>
    %cst_28 = arith.constant 2.500000e-01 : f32
    %54 = vector.broadcast %cst_28 : f32 to vector<8x128xf32>
    %55 = arith.mulf %54, %49 : vector<8x128xf32>
    %56 = arith.addf %55, %51 : vector<8x128xf32>
    %57 = arith.select %53, %51, %56 : vector<8x128xi1>, vector<8x128xf32>
    %c0_29 = arith.constant 0 : index
    %c0_30 = arith.constant 0 : index
    %58 = vector.load %arg2[%c0_29, %c0_30] : memref<8x128xf32, #tpu.memory_space<vmem>>, vector<8x128xf32>
    tpu.vector_store %arg2[%c0_29, %c0_30], %57 {strides = array<i32>} : memref<8x128xf32, #tpu.memory_space<vmem>>, vector<8x128xf32>,
    return
  }
  func.func @transform_0(%arg0: i32) -> (i32, i32, i32) {
    %c0_i32 = arith.constant 0 : i32
    %c0_i32_0 = arith.constant 0 : i32
    %c0_i32_1 = arith.constant 0 : i32
    return %c0_i32, %arg0, %c0_i32_0 : i32, i32, i32
  }
  func.func @transform_1(%arg0: i32) -> (i32, i32) {
    %c0_i32 = arith.constant 0 : i32
    %c0_i32_0 = arith.constant 0 : i32
    return %arg0, %c0_i32 : i32, i32
  }
}

</mosaic_0001>

<bundles_post_ra>
// kernel: lif_voltage_forward_time_major.1
= control target key start
LH: loop header
LB: loop body
LE: loop exit
PB: predicated region body
PF: predicated region fallthrough
CT: control target
= control target key end

     0   :  { %s357_s6 = smov 0   ;;  %s359_s7 = smov 0   ;;  %s421_s0 = inlined_call_operand.vmem [shape: f32[8,16,128], index: 0, kind: input, shape index: {}]   ;;  %s422_s1 = inlined_call_operand.vmem [shape: f32[16,128], index: 1, kind: output, shape index: {}]  }
   0x1   :  { %s361_s8 = smov 0  }
   0x2 LB: > { %s281_s9 = sadd.s32 4294967295, %s345_s8   ;;  %s374_s10 = sadd.s32 1, %s345_s8   ;;  %s345_s8 = sphi %s361_s8, %s425_s8   ;;  %s341_s7 = sphi %s359_s7, %s424_s7   ;;  %s337_s6 = sphi %s357_s6, %s423_s6  }
   0x3   : > { %s15_s11 = ssub.s32 %s345_s8, %s374_s10  ;;  %s18_s12 = sadd.s32 1, %s341_s7 }
   0x4   : > { %p16_p0 = scmp.eq.s32.totalorder %s15_s11, 0  ;;  %p25_p1 = scmp.ne.s32.totalorder %s341_s7, %s337_s6 }
   0x5   : > { %p26_p2 = scmp.eq.s32.totalorder %s345_s8, 0  ;;  %p284_p4 = scmp.ge.s32.totalorder %s345_s8, 2 }
   0x6   : > { %s383_s13 = scalar_select %p16_p0, %s341_s7, %s18_s12  }
   0x7   : > { %p27_p3 = por %p26_p2, %p25_p1  ;;  %77 = sbr.rel (%p284_p4) target bundleno = 24 (0x18), region = 16 }
   0xc   : > { %80 = sbr.rel (!%p27_p3) target bundleno = 24 (0x18), region = 20  ;;  %s82_s14 = sand.u32 (%p27_p3), 1, %s341_s7  }
   0xd   : > { %s286_s15 = sshll.u32 (%p27_p3), %s345_s8, 3  ;;  %s285_s16 = sshll.u32 (%p27_p3), %s82_s14, 6 }
   0xe   : > { %s86_s19 = scalar_lea.vmem (%p27_p3), %s421_s0, %s286_s15  ;;  %s84_s20 = scalar_lea.vmem (%p27_p3), [#allocation2], %s285_s16 }
   0xf   : > { %v129_v0 = vld [vmem:[%s86_s19] sm:$0xff] (%p27_p3)  ;;  %v131_v1 = vld [vmem:[%s86_s19 + $0x10] sm:$0xff] (%p27_p3) }
  0x10   : > { %v133_v2 = vld [vmem:[%s86_s19 + $0x20] sm:$0xff] (%p27_p3)  ;;  %130 = vst [vmem:[%s84_s20] sm:$0xff] (%p27_p3), %v129_v0  ;;  %v135_v3 = vld [vmem:[%s86_s19 + $0x30] sm:$0xff] (%p27_p3) }
  0x11   : > { %132 = vst [vmem:[%s84_s20 + $0x8] sm:$0xff] %v131_v1  ;;  %v137_v4 = vld [vmem:[%s86_s19 + $0x40] sm:$0xff]  ;;  %v139_v5 = vld [vmem:[%s86_s19 + $0x50] sm:$0xff] }
  0x12   : > { %134 = vst [vmem:[%s84_s20 + $0x10] sm:$0xff] %v133_v2  ;;  %v141_v6 = vld [vmem:[%s86_s19 + $0x60] sm:$0xff]  ;;  %v143_v7 = vld [vmem:[%s86_s19 + $0x70] sm:$0xff] }
  0x13   : > { %136 = vst [vmem:[%s84_s20 + $0x18] sm:$0xff] %v135_v3 }
  0x14   : > { %138 = vst [vmem:[%s84_s20 + $0x20] sm:$0xff] %v137_v4 }
  0x15   : > { %140 = vst [vmem:[%s84_s20 + $0x28] sm:$0xff] %v139_v5 }
  0x16   : > { %142 = vst [vmem:[%s84_s20 + $0x30] sm:$0xff] %v141_v6 }
  0x17   : > { %144 = vst [vmem:[%s84_s20 + $0x38] sm:$0xff] %v143_v7 }
  0x18 PF: > { %p287_p5 = scmp.ge.s32.totalorder %s345_s8, 1  ;;  %p149_p6 = scmp.lt.s32.totalorder %s345_s8, 3 }
  0x1a   : > { %p150_p7 = pnand %p287_p5, %p149_p6 }
  0x1b   : > { %s156_s21 = sand.u32 (!%p150_p7), 1, %s337_s6   ;;  %p174_p8 = scmp.lt.s32.totalorder (!%p150_p7), %s281_s9, 1 }
  0x1c   : > { %153 = sbr.rel (%p150_p7) target bundleno = 70 (0x46), region = 58  ;;  %s288_s22 = sshll.u32 (!%p150_p7), %s156_s21, 6 }
  0x1d   : > { %s394_s23 = scalar_lea.vmem (!%p150_p7), [#allocation2], %s288_s22 }
  0x21   : > { %v178_v8 = vld [vmem:[%s394_s23] sm:$0xff]  ;;  %v290_v9 = vld [vmem:[%s394_s23 + $0x8] sm:$0xff]  ;;  %v291_v13 = vld [vmem:[%s394_s23 + $0x10] sm:$0xff]  ;;  %s427_s9 = smov (!%p174_p8, %s281_s9), 1 }
  0x22   : > { %v182_v10 = vmul.f32 0.25, %v178_v8  ;;  %vm181_vm0 = vcmp.gt.f32.partialorder %v178_v8, 0.3  ;;  %v292_v17 = vld [vmem:[%s394_s23 + $0x18] sm:$0xff]  ;;  %v293_v21 = vld [vmem:[%s394_s23 + $0x20] sm:$0xff]  ;;  %v294_v25 = vld [vmem:[%s394_s23 + $0x28] sm:$0xff] }
  0x23   : > { %v295_v29 = vld [vmem:[%s394_s23 + $0x30] sm:$0xff]  ;;  %s289_s24 = sshll.u32 %s427_s9, 3  ;;  %v296_v33 = vld [vmem:[%s394_s23 + $0x38] sm:$0xff] }
  0x24   : > { %v183_v11 = vadd.f32 %v290_v9, %v182_v10  ;;  %s177_s27 = scalar_lea.vmem %s422_s1, %s289_s24 }
  0x26   : > { %v184_v12 = vsel %vm181_vm0, %v290_v9, %v183_v11 }
  0x27   : > { %v188_v14 = vmul.f32 0.25, %v184_v12  ;;  %vm187_vm1 = vcmp.gt.f32.partialorder %v184_v12, 0.3 }
  0x29   : > { %v189_v15 = vadd.f32 %v291_v13, %v188_v14 }
  0x2b   : > { %v190_v16 = vsel %vm187_vm1, %v291_v13, %v189_v15 }
  0x2c   : > { %v194_v18 = vmul.f32 0.25, %v190_v16  ;;  %vm193_vm2 = vcmp.gt.f32.partialorder %v190_v16, 0.3 }
  0x2e   : > { %v195_v19 = vadd.f32 %v292_v17, %v194_v18 }
  0x30   : > { %v196_v20 = vsel %vm193_vm2, %v292_v17, %v195_v19 }
  0x31   : > { %v200_v22 = vmul.f32 0.25, %v196_v20  ;;  %vm199_vm3 = vcmp.gt.f32.partialorder %v196_v20, 0.3 }
  0x33   : > { %v201_v23 = vadd.f32 %v293_v21, %v200_v22 }
  0x35   : > { %v202_v24 = vsel %vm199_vm3, %v293_v21, %v201_v23 }
  0x36   : > { %v206_v26 = vmul.f32 0.25, %v202_v24  ;;  %vm205_vm4 = vcmp.gt.f32.partialorder %v202_v24, 0.3 }
  0x38   : > { %v207_v27 = vadd.f32 %v294_v25, %v206_v26 }
  0x3a   : > { %v208_v28 = vsel %vm205_vm4, %v294_v25, %v207_v27 }
  0x3b   : > { %v212_v30 = vmul.f32 0.25, %v208_v28  ;;  %vm211_vm5 = vcmp.gt.f32.partialorder %v208_v28, 0.3 }
  0x3d   : > { %v213_v31 = vadd.f32 %v295_v29, %v212_v30 }
  0x3f   : > { %v214_v32 = vsel %vm211_vm5, %v295_v29, %v213_v31 }
  0x40   : > { %v218_v34 = vmul.f32 0.25, %v214_v32  ;;  %vm217_vm6 = vcmp.gt.f32.partialorder %v214_v32, 0.3 }
  0x42   : > { %v219_v35 = vadd.f32 %v296_v33, %v218_v34 }
  0x44   : > { %v220_v36 = vsel %vm217_vm6, %v296_v33, %v219_v35 }
  0x45   : > { %221 = vst [vmem:[%s177_s27] sm:$0xff] %v220_v36 }
  0x46 PF: > { %p8_p9 = scmp.ge.s32.totalorder %s374_s10, 4   ;;  %s423_s6 = smov %s341_s7 }
  0x47   : > { %s424_s7 = smov %s383_s13  ;;  %s425_s8 = smov %s374_s10 }
  0x48   :  { %10 = sbr.rel (!%p8_p9) target bundleno = 2 (0x2), region = 104 }

</bundles_post_ra>
